<compile_context>
chip_gen: v5e
topology: v5e:2x2
jax: 0.10.0
libtpu: 0.0.40
codegen_flags: <defaults>
</compile_context>

<pallas_src>
import jax
import jax.numpy as jnp
from jax.experimental import pallas as pl
from jax.experimental.pallas import tpu as pltpu


def _round_up(x, m):
    return (x + m - 1) // m * m


def _decoder_kernel(z_ref, w1_ref, b1_ref, w2_ref, b2_ref,
                    wh_ref, bh_ref, out_ref, h_ref):
    # Hidden layers are recomputed only when entering a new batch tile
    # (j == 0); the bf16 result is held in VMEM scratch and reused for every
    # head-N tile of the same batch tile (the N axis is "arbitrary", i.e.
    # sequential per core, so this dependency is honored).
    @pl.when(pl.program_id(1) == 0)
    def _():
        # Layer 1: bf16 matmul on MXU, f32 accumulate, f32 bias + ReLU on VPU.
        # NB: zero-padded batch rows produce ReLU(bias) != 0 here; they are
        # sliced off in the wrapper, so do not "fix" this by reading them.
        h = jnp.dot(z_ref[...], w1_ref[...],
                    preferred_element_type=jnp.float32)
        h = jnp.maximum(h + b1_ref[...], 0.0)
        # Layer 2.
        h = jnp.dot(h.astype(w2_ref.dtype), w2_ref[...],
                    preferred_element_type=jnp.float32)
        h = jnp.maximum(h + b2_ref[...], 0.0)
        h_ref[...] = h.astype(h_ref.dtype)

    # Fused (mirna ++ mrna) head, one lane-dense (padded, 128-multiple) N tile.
    out = jnp.dot(h_ref[...], wh_ref[...], preferred_element_type=jnp.float32)
    out_ref[...] = (out + bh_ref[...]).astype(out_ref.dtype)


def prepare_params(params, *, head_tile=1024):
    """Fuse + pad the head weights, cast matmul weights to bf16.

    The fused head output dimension is padded to a multiple of 128 (lane-dense
    stores); if it exceeds `head_tile`, it is padded to a multiple of
    `head_tile` so the head N dimension can be tiled evenly.
    """
    head_tile = _round_up(int(head_tile), 128)
    n_mi = int(params["w_mirna"].shape[1])
    n_mr = int(params["w_mrna"].shape[1])
    n_heads = n_mi + n_mr
    n_pad = _round_up(n_heads, 128)
    if n_pad > head_tile:
        n_pad = _round_up(n_pad, head_tile)
        tn = head_tile
    else:
        tn = n_pad

    w_heads = jnp.concatenate([params["w_mirna"], params["w_mrna"]], axis=1)
    w_heads = jnp.pad(w_heads, ((0, 0), (0, n_pad - n_heads)))
    b_heads = jnp.concatenate([params["b_mirna"], params["b_mrna"]], axis=1)
    b_heads = jnp.pad(b_heads, ((0, 0), (0, n_pad - n_heads)))

    return {
        "w1": params["w1"].astype(jnp.bfloat16),
        "b1": params["b1"].astype(jnp.float32),
        "w2": params["w2"].astype(jnp.bfloat16),
        "b2": params["b2"].astype(jnp.float32),
        "w_heads": w_heads.astype(jnp.bfloat16),
        "b_heads": b_heads.astype(jnp.float32),
        "n_mi": n_mi,
        "n_mr": n_mr,
        "n_pad": n_pad,
        "head_tile": tn,
    }


def _pick_batch_tile(B, requested=None):
    """Large tiles amortize the ~0.35us/step pipeline overhead; multiples of
    256 fill the 256-wide MXU on v6e/v7x; >=2 grid steps when the batch allows
    keeps both v7x TensorCores busy; 16-row rounding matches bf16 packing."""
    if requested is not None:
        return _round_up(min(int(requested), _round_up(B, 16)), 16)
    b16 = _round_up(B, 16)
    if b16 <= 256:
        return b16                                   # one small tile
    if b16 <= 1024:
        return _round_up(pl.cdiv(b16, 2), 256)       # two MXU-aligned tiles
    return 1024                                      # big batches: 1024 rows


def _estimate_vmem_bytes(TB, TN, D, h0, h1, out_bytes):
    b = 0
    b += 2 * TB * D * 2                                  # z tile, bf16, x2 bufs
    b += 2 * TB * TN * out_bytes                         # out tile, x2 bufs
    b += 2 * ((D * h0 + h0 * h1) * 2 + (h0 + h1) * 4)    # w1/w2 bf16 + b1/b2 f32
    b += 2 * (h1 * TN * 2 + TN * 4)                      # head weight/bias tile
    b += TB * h1 * 2                                     # h scratch (bf16)
    b += TB * (h0 + h1 + TN) * 4                         # f32 intermediates
    return b


def _decoder_forward_jnp(z, prep):
    """Fused plain-jnp path for tiny batches (same bf16/f32 numerics)."""
    def mm(x, w):
        return jnp.dot(x.astype(jnp.bfloat16), w,
                       preferred_element_type=jnp.float32)
    h = jnp.maximum(mm(z, prep["w1"]) + prep["b1"], 0.0)
    h = jnp.maximum(mm(h, prep["w2"]) + prep["b2"], 0.0)
    out = mm(h, prep["w_heads"]) + prep["b_heads"]
    n_mi, n_mr = prep["n_mi"], prep["n_mr"]
    return [out[:, :n_mi], out[:, n_mi:n_mi + n_mr]]


def decoder_forward(z, prep, *, batch_tile=None, out_dtype=jnp.float32,
                    small_batch_threshold=256, force_pallas=False):
    """Runs the whole Decoder forward in a single Pallas call.

    z: (B, input_dim) float32
    prep: output of prepare_params().
    Returns [out_mirna, out_mrna].
    """
    B, D = z.shape
    n_mi, n_mr = prep["n_mi"], prep["n_mr"]
    n_pad = prep["n_pad"]
    TN = prep["head_tile"]
    h0 = prep["w1"].shape[1]
    h1 = prep["w2"].shape[1]

    # Tiny batches: fixed pallas_call/DMA setup cost dominates -> plain jnp.
    if not force_pallas and B < small_batch_threshold:
        return _decoder_forward_jnp(z, prep)

    TB = _pick_batch_tile(B, batch_tile)
    B_pad = _round_up(B, TB)
    z_pad = z if B_pad == B else jnp.pad(z, ((0, B_pad - B), (0, 0)))
    z_pad = z_pad.astype(jnp.bfloat16)

    out_bytes = jnp.dtype(out_dtype).itemsize
    vmem_limit = int(min(max(2 * _estimate_vmem_bytes(TB, TN, D, h0, h1,
                                                      out_bytes) + (4 << 20),
                             32 << 20),
                         64 << 20))

    flops = 2 * B_pad * (D * h0 + h0 * h1 + h1 * n_pad)
    bytes_accessed = (B_pad * D * 2 + B_pad * n_pad * out_bytes
                      + (D * h0 + h0 * h1 + h1 * n_pad) * 2
                      + (h0 + h1 + n_pad) * 4)

    kernel = pl.pallas_call(
        _decoder_kernel,
        out_shape=jax.ShapeDtypeStruct((B_pad, n_pad), out_dtype),
        grid=(B_pad // TB, n_pad // TN),
        in_specs=[
            pl.BlockSpec((TB, D), lambda i, j: (i, 0)),
            pl.BlockSpec(prep["w1"].shape, lambda i, j: (0, 0)),
            pl.BlockSpec(prep["b1"].shape, lambda i, j: (0, 0)),
            pl.BlockSpec(prep["w2"].shape, lambda i, j: (0, 0)),
            pl.BlockSpec(prep["b2"].shape, lambda i, j: (0, 0)),
            pl.BlockSpec((h1, TN), lambda i, j: (0, j)),
            pl.BlockSpec((1, TN), lambda i, j: (0, j)),
        ],
        out_specs=pl.BlockSpec((TB, TN), lambda i, j: (i, j)),
        scratch_shapes=[pltpu.VMEM((TB, h1), jnp.bfloat16)],
        compiler_params=pltpu.CompilerParams(
            dimension_semantics=("parallel", "arbitrary"),
            vmem_limit_bytes=vmem_limit),
        cost_estimate=pl.CostEstimate(flops=flops, transcendentals=0,
                                      bytes_accessed=bytes_accessed),
    )
    out = kernel(z_pad, prep["w1"], prep["b1"], prep["w2"], prep["b2"],
                 prep["w_heads"], prep["b_heads"])
    out = out[:B]
    return [out[:, :n_mi], out[:, n_mi:n_mi + n_mr]]


def _linear_init(key, fan_in, fan_out):
    """Deterministic init matching torch.nn.Linear default (Kaiming uniform)."""
    kw, kb = jax.random.split(key)
    bound = 1.0 / jnp.sqrt(jnp.float32(fan_in))
    # Stored directly in (in, out) layout for the kernel's z @ W convention.
    w = jax.random.uniform(kw, (fan_in, fan_out), jnp.float32, -bound, bound)
    b = jax.random.uniform(kb, (1, fan_out), jnp.float32, -bound, bound)
    return w, b


def make_params(key, input_dim, hidden_dims, n_feat_mirna, n_feat_mrna):
    keys = jax.random.split(key, len(hidden_dims) + 2)
    params = {}
    d = input_dim
    for i, h in enumerate(hidden_dims):
        w, b = _linear_init(keys[i], d, h)
        params[f"w{i + 1}"] = w
        params[f"b{i + 1}"] = b
        d = h
    params["w_mirna"], params["b_mirna"] = _linear_init(
        keys[len(hidden_dims)], d, n_feat_mirna)
    params["w_mrna"], params["b_mrna"] = _linear_init(
        keys[len(hidden_dims) + 1], d, n_feat_mrna)
    return params


def decoder_reference(z, params):
    """Pure-JAX reference emulating the kernel's bf16-in / f32-accumulate dots."""
    def mm(x, w):
        return jnp.dot(x.astype(jnp.bfloat16), w.astype(jnp.bfloat16),
                       preferred_element_type=jnp.float32)
    h = jnp.maximum(mm(z, params["w1"]) + params["b1"], 0.0)
    h = jnp.maximum(mm(h, params["w2"]) + params["b2"], 0.0)
    out_mi = mm(h, params["w_mirna"]) + params["b_mirna"]
    out_mr = mm(h, params["w_mrna"]) + params["b_mrna"]
    return [out_mi, out_mr]


if __name__ == "__main__":
    # Small shapes: latent dim 32, hidden_dims=[64, 128], two NB heads.
    B = 8
    input_dim = 32
    hidden_dims = [64, 128]
    n_feat_mirna = 48
    n_feat_mrna = 96

    key = jax.random.PRNGKey(0)
    kz, kp = jax.random.split(key)
    z = jax.random.normal(kz, (B, input_dim), jnp.float32)
    params = make_params(kp, input_dim, hidden_dims, n_feat_mirna, n_feat_mrna)
    prep = prepare_params(params)

    # force_pallas=True so the demo exercises the kernel (a real B=8 workload
    # would be routed to the plain-jnp path by the small-batch dispatch).
    out = decoder_forward(z, prep, force_pallas=True)
    out = jax.block_until_ready(out)

    ref = decoder_reference(z, params)
    for o, r in zip(out, ref):
        assert o.shape == r.shape, (o.shape, r.shape)
        assert jnp.max(jnp.abs(o - r)) < 1e-2, "mismatch vs JAX reference"

    print("KERNEL_OK")
</pallas_src>

<mosaic_0001>
module attributes {stable_mosaic.version = 11 : i64} {
  func.func @_decoder_kernel(%arg0: i32, %arg1: i32, %arg2: memref<16x32xbf16, #tpu.memory_space<vmem>>, %arg3: memref<32x64xbf16, #tpu.memory_space<vmem>>, %arg4: memref<1x64xf32, #tpu.memory_space<vmem>>, %arg5: memref<64x128xbf16, #tpu.memory_space<vmem>>, %arg6: memref<1x128xf32, #tpu.memory_space<vmem>>, %arg7: memref<128x256xbf16, #tpu.memory_space<vmem>>, %arg8: memref<1x256xf32, #tpu.memory_space<vmem>>, %arg9: memref<16x256xf32, #tpu.memory_space<vmem>>, %arg10: memref<16x128xbf16, #tpu.memory_space<vmem>>) attributes {dimension_semantics = [#tpu.dimension_semantics<parallel>, #tpu.dimension_semantics<arbitrary>], iteration_bounds = array<i64: 1, 1>, scalar_prefetch = 0 : i64, scratch_operands = 1 : i64, tpu.core_type = #tpu.core_type<tc>, window_params = [{transform_indices = @transform_0, window_bounds = array<i64: 16, 32>}, {pipeline_mode = #tpu.pipeline_mode<synchronous>, transform_indices = @transform_1, window_bounds = array<i64: 32, 64>}, {pipeline_mode = #tpu.pipeline_mode<synchronous>, transform_indices = @transform_2, window_bounds = array<i64: 1, 64>}, {pipeline_mode = #tpu.pipeline_mode<synchronous>, transform_indices = @transform_3, window_bounds = array<i64: 64, 128>}, {pipeline_mode = #tpu.pipeline_mode<synchronous>, transform_indices = @transform_4, window_bounds = array<i64: 1, 128>}, {transform_indices = @transform_5, window_bounds = array<i64: 128, 256>}, {transform_indices = @transform_6, window_bounds = array<i64: 1, 256>}, {transform_indices = @transform_7, window_bounds = array<i64: 16, 256>}]} {
    %c0_i32 = arith.constant 0 : i32
    %0 = arith.cmpi eq, %arg1, %c0_i32 : i32
    %1 = arith.extui %0 : i1 to i32
    %c0_i32_0 = arith.constant 0 : i32
    %2 = arith.cmpi ne, %1, %c0_i32_0 : i32
    scf.if %2 {
      %c0_8 = arith.constant 0 : index
      %c0_9 = arith.constant 0 : index
      %10 = vector.load %arg2[%c0_8, %c0_9] : memref<16x32xbf16, #tpu.memory_space<vmem>>, vector<16x32xbf16>
      %c0_10 = arith.constant 0 : index
      %c0_11 = arith.constant 0 : index
      %11 = vector.load %arg3[%c0_10, %c0_11] : memref<32x64xbf16, #tpu.memory_space<vmem>>, vector<32x64xbf16>
      %cst_12 = arith.constant dense<0.000000e+00> : vector<16x64xf32>
      %12 = tpu.matmul %10, %11, %cst_12 {dimension_numbers = #tpu.dot_dimension_numbers<[1], [0], [0], [1], [0, 0, 1, 1], [], []>} : vector<16x32xbf16>, vector<32x64xbf16>, vector<16x64xf32> -> vector<16x64xf32>
      %c0_13 = arith.constant 0 : index
      %c0_14 = arith.constant 0 : index
      %13 = vector.load %arg4[%c0_13, %c0_14] : memref<1x64xf32, #tpu.memory_space<vmem>>, vector<1x64xf32>
      %14 = vector.broadcast %13 : vector<1x64xf32> to vector<16x64xf32>
      %15 = arith.addf %12, %14 : vector<16x64xf32>
      %cst_15 = arith.constant 0.000000e+00 : f32
      %16 = vector.broadcast %cst_15 : f32 to vector<16x64xf32>
      %17 = arith.maximumf %15, %16 : vector<16x64xf32>
      %18 = arith.truncf %17 : vector<16x64xf32> to vector<16x64xbf16>
      %c0_16 = arith.constant 0 : index
      %c0_17 = arith.constant 0 : index
      %19 = vector.load %arg5[%c0_16, %c0_17] : memref<64x128xbf16, #tpu.memory_space<vmem>>, vector<64x128xbf16>
      %cst_18 = arith.constant dense<0.000000e+00> : vector<16x128xf32>
      %20 = tpu.matmul %18, %19, %cst_18 {dimension_numbers = #tpu.dot_dimension_numbers<[1], [0], [0], [1], [0, 0, 1, 1], [], []>} : vector<16x64xbf16>, vector<64x128xbf16>, vector<16x128xf32> -> vector<16x128xf32>
      %c0_19 = arith.constant 0 : index
      %c0_20 = arith.constant 0 : index
      %21 = vector.load %arg6[%c0_19, %c0_20] : memref<1x128xf32, #tpu.memory_space<vmem>>, vector<1x128xf32>
      %22 = vector.broadcast %21 : vector<1x128xf32> to vector<16x128xf32>
      %23 = arith.addf %20, %22 : vector<16x128xf32>
      %cst_21 = arith.constant 0.000000e+00 : f32
      %24 = vector.broadcast %cst_21 : f32 to vector<16x128xf32>
      %25 = arith.maximumf %23, %24 : vector<16x128xf32>
      %26 = arith.truncf %25 : vector<16x128xf32> to vector<16x128xbf16>
      %c0_22 = arith.constant 0 : index
      %c0_23 = arith.constant 0 : index
      %27 = vector.load %arg10[%c0_22, %c0_23] : memref<16x128xbf16, #tpu.memory_space<vmem>>, vector<16x128xbf16>
      tpu.vector_store %arg10[%c0_22, %c0_23], %26 {strides = array<i32>} : memref<16x128xbf16, #tpu.memory_space<vmem>>, vector<16x128xbf16>,
    } else {
    }
    %c0 = arith.constant 0 : index
    %c0_1 = arith.constant 0 : index
    %3 = vector.load %arg10[%c0, %c0_1] : memref<16x128xbf16, #tpu.memory_space<vmem>>, vector<16x128xbf16>
    %c0_2 = arith.constant 0 : index
    %c0_3 = arith.constant 0 : index
    %4 = vector.load %arg7[%c0_2, %c0_3] : memref<128x256xbf16, #tpu.memory_space<vmem>>, vector<128x256xbf16>
    %cst = arith.constant dense<0.000000e+00> : vector<16x256xf32>
    %5 = tpu.matmul %3, %4, %cst {dimension_numbers = #tpu.dot_dimension_numbers<[1], [0], [0], [1], [0, 0, 1, 1], [], []>} : vector<16x128xbf16>, vector<128x256xbf16>, vector<16x256xf32> -> vector<16x256xf32>
    %c0_4 = arith.constant 0 : index
    %c0_5 = arith.constant 0 : index
    %6 = vector.load %arg8[%c0_4, %c0_5] : memref<1x256xf32, #tpu.memory_space<vmem>>, vector<1x256xf32>
    %7 = vector.broadcast %6 : vector<1x256xf32> to vector<16x256xf32>
    %8 = arith.addf %5, %7 : vector<16x256xf32>
    %c0_6 = arith.constant 0 : index
    %c0_7 = arith.constant 0 : index
    %9 = vector.load %arg9[%c0_6, %c0_7] : memref<16x256xf32, #tpu.memory_space<vmem>>, vector<16x256xf32>
    tpu.vector_store %arg9[%c0_6, %c0_7], %8 {strides = array<i32>} : memref<16x256xf32, #tpu.memory_space<vmem>>, vector<16x256xf32>,
    return
  }
  func.func @transform_0(%arg0: i32, %arg1: i32) -> (i32, i32) {
    %c0_i32 = arith.constant 0 : i32
    %c0_i32_0 = arith.constant 0 : i32
    return %arg0, %c0_i32 : i32, i32
  }
  func.func @transform_1(%arg0: i32, %arg1: i32) -> (i32, i32) {
    %c0_i32 = arith.constant 0 : i32
    %c0_i32_0 = arith.constant 0 : i32
    %c0_i32_1 = arith.constant 0 : i32
    return %c0_i32, %c0_i32_0 : i32, i32
  }
  func.func @transform_2(%arg0: i32, %arg1: i32) -> (i32, i32) {
    %c0_i32 = arith.constant 0 : i32
    %c0_i32_0 = arith.constant 0 : i32
    %c0_i32_1 = arith.constant 0 : i32
    return %c0_i32, %c0_i32_0 : i32, i32
  }
  func.func @transform_3(%arg0: i32, %arg1: i32) -> (i32, i32) {
    %c0_i32 = arith.constant 0 : i32
    %c0_i32_0 = arith.constant 0 : i32
    %c0_i32_1 = arith.constant 0 : i32
    return %c0_i32, %c0_i32_0 : i32, i32
  }
  func.func @transform_4(%arg0: i32, %arg1: i32) -> (i32, i32) {
    %c0_i32 = arith.constant 0 : i32
    %c0_i32_0 = arith.constant 0 : i32
    %c0_i32_1 = arith.constant 0 : i32
    return %c0_i32, %c0_i32_0 : i32, i32
  }
  func.func @transform_5(%arg0: i32, %arg1: i32) -> (i32, i32) {
    %c0_i32 = arith.constant 0 : i32
    %c0_i32_0 = arith.constant 0 : i32
    return %c0_i32, %arg1 : i32, i32
  }
  func.func @transform_6(%arg0: i32, %arg1: i32) -> (i32, i32) {
    %c0_i32 = arith.constant 0 : i32
    %c0_i32_0 = arith.constant 0 : i32
    return %c0_i32, %arg1 : i32, i32
  }
  func.func @transform_7(%arg0: i32, %arg1: i32) -> (i32, i32) {
    %c0_i32 = arith.constant 0 : i32
    return %arg0, %arg1 : i32, i32
  }
}

</mosaic_0001>

<bundles_post_ra>
// kernel: tpu_custom_call.1
= control target key start
LH: loop header
LB: loop body
LE: loop exit
PB: predicated region body
PF: predicated region fallthrough
CT: control target
= control target key end

     0   :  { %12 = vsyncpa [#allocation4], 0  ;;  %s748_s0 = inlined_call_operand.hbm [shape: bf16[16,32], index: 0, kind: input, shape index: {}]   ;;  %s749_s1 = inlined_call_operand.hbm [shape: bf16[32,64], index: 1, kind: input, shape index: {}]   ;;  %s750_s2 = inlined_call_operand.vmem [shape: f32[1,64], index: 2, kind: input, shape index: {}]   ;;  %s751_s3 = inlined_call_operand.hbm [shape: bf16[64,128], index: 3, kind: input, shape index: {}]   ;;  %s752_s4 = inlined_call_operand.hbm [shape: f32[1,128], index: 4, kind: input, shape index: {}]   ;;  %s753_s5 = inlined_call_operand.hbm [shape: bf16[128,256], index: 5, kind: input, shape index: {}]   ;;  %s754_s6 = inlined_call_operand.vmem [shape: f32[1,256], index: 6, kind: input, shape index: {}]   ;;  %s755_s7 = inlined_call_operand.hbm [shape: f32[16,256], index: 7, kind: output, shape index: {}]  }
   0x1   :  { %13 = vsyncpa [#allocation7], 0 }
   0x2   :  { %14 = vsyncpa [#allocation10], 0 }
   0x3   :  { %15 = vsyncpa [#allocation5], 0  ;;  %s33_s26 = sshll.u32 %s749_s1, 4  ;;  %s672_s27 = smov [#allocation6]   ;;  %s34_s26 = int_to_ptr.hbm [resolvable:$true] %s33_s26 }
   0x4   :  { %s35_s28 = sshll.u32 %s672_s27, 4  ;;  %s62_s8 = sshll.u32 %s752_s4, 4  ;;  %s36_s28 = int_to_ptr.vmem [resolvable:$true] %s35_s28  ;;  %s63_s8 = int_to_ptr.hbm [resolvable:$true] %s62_s8 }
   0x5   :  { %s673_s9 = smov 64   ;;  %s674_s10 = smov 4  }
   0x6   :  { %41 = dma.hbm_to_vmem [thread:$0]  %s34_s26, 256, %s36_s28, [#allocation7], %s673_s9, %s673_s9, %s674_s10  }
   0x7   :  { %s675_s11 = smov [#allocation9]   ;;  %s20_s15 = sshll.u32 %s748_s0, 4  ;;  %s21_s15 = int_to_ptr.hbm [resolvable:$true] %s20_s15 }
   0x8   :  { %s64_s12 = sshll.u32 %s675_s11, 4  ;;  %s48_s17 = sshll.u32 %s751_s3, 4  ;;  %s65_s12 = int_to_ptr.vmem [resolvable:$true] %s64_s12  ;;  %s49_s17 = int_to_ptr.hbm [resolvable:$true] %s48_s17 }
   0x9   :  { %67 = dma.hbm_to_vmem [thread:$0]  %s63_s8, 16, %s65_s12, [#allocation10]  }
   0xa   :  { %s676_s18 = smov [#allocation3]   ;;  %s677_s4 = smov [#allocation8]  }
   0xb   :  { %s22_s19 = sshll.u32 %s676_s18, 4  ;;  %s50_s20 = sshll.u32 %s677_s4, 4  ;;  %s23_s19 = int_to_ptr.vmem [resolvable:$true] %s22_s19  ;;  %s51_s20 = int_to_ptr.vmem [resolvable:$true] %s50_s20 }
   0xc   :  { %28 = dma.hbm_to_vmem [thread:$0]  %s21_s15, 128, %s23_s19, [#allocation4], %s673_s9, %s673_s9, %s674_s10  }
   0xd   :  { %s72_s23 = sshll.u32 %s753_s5, 4  ;;  %s678_s0 = smov [#allocation11]   ;;  %s73_s23 = int_to_ptr.hbm [resolvable:$true] %s72_s23 }
   0xe   :  { %56 = dma.hbm_to_vmem [thread:$0]  %s49_s17, 512, %s51_s20, [#allocation7], %s673_s9, %s673_s9, %s674_s10  }
   0xf   :  { %s74_s24 = sshll.u32 %s678_s0, 4  ;;  %s679_s25 = smov 128   ;;  %s75_s24 = int_to_ptr.vmem [resolvable:$true] %s74_s24 }
  0x10   :  { %s680_s26 = smov 8  }
  0x11   :  { %80 = dma.hbm_to_vmem [thread:$0]  %s73_s23, 2048, %s75_s24, [#allocation10], %s679_s25, %s679_s25, %s680_s26  }
  0x12   :  { %664 = dma.done.wait [#allocation4], 128  }
  0x13   :  { %665 = vsyncadd [#allocation4], 4294967168 }
  0x14   :  { %666 = dma.done.wait [#allocation7], 768  }
  0x15   :  { %667 = vsyncadd [#allocation7], 4294966528 }
  0x16   :  { %668 = dma.done.wait [#allocation10], 2064  }
  0x17   :  { %669 = vsyncadd [#allocation10], 4294965232  ;;  %v479_v0 = vld [vmem:[#allocation6 + $0x8] sm:$0xff]  ;;  %v478_v1 = vld [vmem:[#allocation6] sm:$0xff]  ;;  %vm135_vm0 = vcmask 261120   ;;  %vm192_vm1 = vcmask 523264  }
  0x18   :  { %145 = vmatpush.bf16.msra.mxu0 %v479_v0  ;;  %v477_v2 = vld [vmem:[#allocation3] sm:$0xff]  ;;  %v483_v3 = vld [vmem:[#allocation8 + $0x18] sm:$0xff]  ;;  %v482_v4 = vld [vmem:[#allocation8 + $0x10] sm:$0xff]  ;;  %s681_s28 = smov [#allocation12]   ;;  %s364_s9 = sshll.u32 %s755_s7, 4  ;;  %s365_s9 = int_to_ptr.hbm [resolvable:$true] %s364_s9 }
  0x19   :  { %200 = vmatpush.bf16.msra.mxu1 %v483_v3  ;;  %v481_v5 = vld [vmem:[#allocation8 + $0x8] sm:$0xff]  ;;  %v480_v6 = vld [vmem:[#allocation8] sm:$0xff]  ;;  %v471_v7 = vld [vmem:[#allocation11 + $0x70] sm:$0xf]  ;;  %s362_s29 = sshll.u32 %s681_s28, 4  ;;  %s683_s10 = smov 16   ;;  %s363_s29 = int_to_ptr.vmem [resolvable:$true] %s362_s29 }
  0x1a   :  { %v500_v8 = vld [vmem:[#allocation11 + $0x74] sm:$0xf0]  ;;  %v499_v9 = vld [vmem:[#allocation11 + $0x74] sm:$0xf]  ;;  %v473_v11 = vld [vmem:[#allocation11 + $0x78] sm:$0xf0] }
  0x1b   :  { %v472_v10 = vor.u32 %v500_v8, %v471_v7  ;;  %v463_v12 = vld [vmem:[#allocation11 + $0x60] sm:$0xf]  ;;  %v498_v13 = vld [vmem:[#allocation11 + $0x64] sm:$0xf0]  ;;  %v476_v14 = vor.u32 %v499_v9, %v473_v11  ;;  %v497_v15 = vld [vmem:[#allocation11 + $0x64] sm:$0xf] }
  0x1c   :  { %146 = vmatpush.bf16.msra.mxu0 %v478_v1  ;;  %v465_v16 = vld [vmem:[#allocation11 + $0x68] sm:$0xf0]  ;;  %v464_v17 = vor.u32 %v498_v13, %v463_v12  ;;  %v518_v20 = vld [vmem:[%s750_s2] ss:$0 sm:$0xff]  ;;  %v455_v27 = vld [vmem:[#allocation11 + $0x50] sm:$0xf] }
  0x1d   :  { %201 = vmatpush.bf16.msra.mxu1 %v482_v4  ;;  %326 = vmatpush.bf16.msra.mxu2 %v472_v10  ;;  %v468_v18 = vor.u32 %v497_v15, %v465_v16  ;;  %v496_v28 = vld [vmem:[#allocation11 + $0x54] sm:$0xf0]  ;;  %v495_v29 = vld [vmem:[#allocation11 + $0x54] sm:$0xf]  ;;  %v457_v31 = vld [vmem:[#allocation11 + $0x58] sm:$0xf0] }
  0x1e   :  { %340 = vmatpush.bf16.msra.mxu3 %v476_v14  ;;  %v456_v30 = vor.u32 %v496_v28, %v455_v27  ;;  %v460_v32 = vor.u32 %v495_v29, %v457_v31  ;;  %v447_v33 = vld [vmem:[#allocation11 + $0x40] sm:$0xf]  ;;  %v494_v34 = vld [vmem:[#allocation11 + $0x44] sm:$0xf0]  ;;  %v493_v35 = vld [vmem:[#allocation11 + $0x44] sm:$0xf] }
  0x1f   :  { %391 = vmatmul.msk.bf16.vlgmr.msra.gmra.mxu0 %vm135_vm0, %v477_v2  ;;  %v448_v36 = vor.u32 %v494_v34, %v447_v33  ;;  %v449_v37 = vld [vmem:[#allocation11 + $0x48] sm:$0xf0]  ;;  %v439_v39 = vld [vmem:[#allocation11 + $0x30] sm:$0xf]  ;;  %v492_v40 = vld [vmem:[#allocation11 + $0x34] sm:$0xf0] }
  0x20   :  { %v452_v38 = vor.u32 %v493_v35, %v449_v37  ;;  %v491_v41 = vld [vmem:[#allocation11 + $0x34] sm:$0xf]  ;;  %v440_v42 = vor.u32 %v492_v40, %v439_v39  ;;  %v441_v43 = vld [vmem:[#allocation11 + $0x38] sm:$0xf0]  ;;  %v431_v45 = vld [vmem:[#allocation11 + $0x20] sm:$0xf] }
  0x21   :  { %202 = vmatpush.bf16.msra.mxu1 %v481_v5  ;;  %327 = vmatpush.bf16.msra.mxu2 %v464_v17  ;;  %v444_v44 = vor.u32 %v491_v41, %v441_v43  ;;  %v490_v46 = vld [vmem:[#allocation11 + $0x24] sm:$0xf0]  ;;  %v489_v47 = vld [vmem:[#allocation11 + $0x24] sm:$0xf]  ;;  %v433_v49 = vld [vmem:[#allocation11 + $0x28] sm:$0xf0] }
  0x22   :  { %341 = vmatpush.bf16.msra.mxu3 %v468_v18  ;;  %v432_v48 = vor.u32 %v490_v46, %v431_v45  ;;  %v436_v50 = vor.u32 %v489_v47, %v433_v49  ;;  %v423_v51 = vld [vmem:[#allocation11 + $0x10] sm:$0xf]  ;;  %v488_v52 = vld [vmem:[#allocation11 + $0x14] sm:$0xf0]  ;;  %v487_v53 = vld [vmem:[#allocation11 + $0x14] sm:$0xf] }
  0x23   :  { %v424_v54 = vor.u32 %v488_v52, %v423_v51  ;;  %v425_v55 = vld [vmem:[#allocation11 + $0x18] sm:$0xf0]  ;;  %v415_v56 = vld [vmem:[#allocation11] sm:$0xf]  ;;  %v486_v57 = vld [vmem:[#allocation11 + $0x4] sm:$0xf0] }
  0x24   :  { %v428_v58 = vor.u32 %v487_v53, %v425_v55  ;;  %v485_v59 = vld [vmem:[#allocation11 + $0x4] sm:$0xf]  ;;  %v417_v60 = vld [vmem:[#allocation11 + $0x8] sm:$0xf0]  ;;  %v416_v61 = vor.u32 %v486_v57, %v415_v56  ;;  %v519_v0 = vld [vmem:[#allocation9] ss:$0 sm:$0xff] }
  0x25   :  { %203 = vmatpush.bf16.msra.mxu1 %v480_v6  ;;  %328 = vmatpush.bf16.msra.mxu2 %v456_v30  ;;  %v420_v62 = vor.u32 %v485_v59, %v417_v60  ;;  %v234_v8 = vld [vmem:[%s754_s6] sm:$0x3]  ;;  %s682_s6 = smov 256  }
  0x26   :  { %342 = vmatpush.bf16.msra.mxu3 %v460_v32  ;;  %v236_v9 = vperm.slane %v234_v8, 0  ;;  %v237_v10 = vperm.slane %v234_v8, 1 }
  0x29   :  { %329 = vmatpush.bf16.msra.mxu2 %v448_v36 }
  0x2a   :  { %343 = vmatpush.bf16.msra.mxu3 %v452_v38 }
  0x2d   :  { %330 = vmatpush.bf16.msra.mxu2 %v440_v42 }
  0x2e   :  { %344 = vmatpush.bf16.msra.mxu3 %v444_v44 }
  0x31   :  { %331 = vmatpush.bf16.msra.mxu2 %v432_v48 }
  0x32   :  { %345 = vmatpush.bf16.msra.mxu3 %v436_v50 }
  0x35   :  { %332 = vmatpush.bf16.msra.mxu2 %v424_v54 }
  0x36   :  { %346 = vmatpush.bf16.msra.mxu3 %v428_v58 }
  0x39   :  { %333 = vmatpush.bf16.msra.mxu2 %v416_v61 }
  0x3a   :  { %347 = vmatpush.bf16.msra.mxu3 %v420_v62 }
  0x9c   :  { %v148_v19 = vpop.f32.mrf.mxu0 }
  0x9d   :  { %v149_v21 = vadd.f32 %v518_v20, %v148_v19 }
  0x9f   :  { %v153_v24 = vmax.f32 %v149_v21, 0.0 }
  0xa4   :  { %v150_v22 = vpop.f32.mrf.mxu0 }
  0xa5   :  { %v151_v23 = vadd.f32 %v518_v20, %v150_v22 }
  0xa7   :  { %v154_v25 = vmax.f32 %v151_v23, 0.0 }
  0xa9   :  { %v155_v26 = vpack.c.bf16 %v154_v25, %v153_v24 }
  0xab   :  { %408 = vmatmul.msk.bf16.vlgmr.msra.gmra.mxu1 %vm192_vm1, %v155_v26 }
 0x128   :  { %v205_v63 = vpop.f32.mrf.mxu1 }
 0x129   :  { %v206_v1 = vadd.f32 %v519_v0, %v205_v63 }
 0x12b   :  { %v210_v4 = vmax.f32 %v206_v1, 0.0 }
 0x130   :  { %v207_v2 = vpop.f32.mrf.mxu1 }
 0x131   :  { %v208_v3 = vadd.f32 %v519_v0, %v207_v2 }
 0x133   :  { %v211_v5 = vmax.f32 %v208_v3, 0.0 }
 0x135   :  { %v504_v6 = vpack.c.bf16 %v211_v5, %v210_v4 }
 0x137   :  { %505 = vst [vmem:[#allocation2] sm:$0xff] %v504_v6  }
 0x13e   :  { %v484_v7 = vld [vmem:[#allocation2] sm:$0xff] }
 0x13f   :  { %334 = vmatmul.bf16.vlgmr.msra.gmra.mxu2 %v484_v7  ;;  %348 = vmatmul.bf16.vlgmr.msra.gmra.mxu3 %v484_v7 }
 0x1c2   :  { %v335_v11 = vpop.f32.mrf.mxu2  ;;  %v349_v12 = vpop.f32.mrf.mxu3 }
 0x1c3   :  { %v336_v13 = vadd.f32 %v335_v11, %v236_v9  ;;  %v350_v14 = vadd.f32 %v349_v12, %v237_v10 }
 0x1c5   :  { %354 = vst [vmem:[#allocation12] sm:$0xff] %v336_v13 }
 0x1c6   :  { %355 = vst [vmem:[#allocation12 + $0x8] sm:$0xff] %v350_v14 }
 0x1ca   :  { %v337_v15 = vpop.f32.mrf.mxu2  ;;  %v351_v16 = vpop.f32.mrf.mxu3 }
 0x1cb   :  { %v338_v17 = vadd.f32 %v337_v15, %v236_v9  ;;  %v352_v18 = vadd.f32 %v351_v16, %v237_v10 }
 0x1cd   :  { %356 = vst [vmem:[#allocation12 + $0x10] sm:$0xff] %v338_v17 }
 0x1ce   :  { %357 = vst [vmem:[#allocation12 + $0x18] sm:$0xff] %v352_v18 }
 0x1cf   :  { %370 = dma.vmem_to_hbm [thread:$0]  %s363_s29, 512, %s365_s9, [#allocation5], %s682_s6, %s682_s6, %s683_s10  }
 0x1d0   :  { %670 = dma.done.wait [#allocation5], 512  }
 0x1d1   :  { %671 = vsyncadd [#allocation5], 4294966784 }
 0x1d2   :  { %375 = vsyncpa [#allocation4], 1 }
 0x1d3   :  { %376 = vsyncpa [#allocation7], 1 }
 0x1d4   :  { %377 = vsyncpa [#allocation10], 1 }
 0x1d5   :  { %378 = vsyncpa [#allocation5], 1 }

</bundles_post_ra>
